<compile_context>
chip_gen: v7x
topology: tpu7x:2x2x1
jax: 0.10.0
libtpu: 0.0.40
codegen_flags: <defaults>
</compile_context>

<pallas_src>
import functools

import jax
import jax.numpy as jnp
from jax.experimental import pallas as pl
from jax.experimental.pallas import tpu as pltpu

_LN_EPS = 1e-5  # torch.nn.LayerNorm default


# ---------------------------------------------------------------------------
# Pallas kernel
# ---------------------------------------------------------------------------
def _tds_fc_block_kernel(x_ref, w1_ref, b1_ref, w2_ref, b2_ref, g_ref, bb_ref,
                         out_ref):
    """One (rows_tile, C) slab of TDSFullyConnectedBlock.

    x_ref          : (rows_tile, C)  activations (compute dtype, e.g. bf16)
    w1_ref, w2_ref : (C, C)          Linear weights, pre-transposed to (in, out)
    b1_ref, b2_ref : (1, C)          f32 biases
    g_ref, bb_ref  : (1, C)          f32 LayerNorm gamma / beta
    out_ref        : (rows_tile, C)  output slab (original activation dtype)
    """
    x = x_ref[...]

    # fc1 + ReLU (MXU matmul, f32 accumulation; bias/ReLU on VPU in f32).
    h = jnp.dot(x, w1_ref[...], preferred_element_type=jnp.float32) + b1_ref[...]
    h = jnp.maximum(h, 0.0)

    # fc2 (cast back to the MXU-native compute dtype for the second matmul).
    y = jnp.dot(h.astype(w2_ref.dtype), w2_ref[...],
                preferred_element_type=jnp.float32) + b2_ref[...]

    # Residual + LayerNorm over the feature (lane) axis, all in f32.
    z = y + x.astype(jnp.float32)
    mu = jnp.mean(z, axis=-1, keepdims=True)
    var = jnp.mean(jnp.square(z - mu), axis=-1, keepdims=True)
    zn = (z - mu) * jax.lax.rsqrt(var + _LN_EPS)
    out_ref[...] = (zn * g_ref[...] + bb_ref[...]).astype(out_ref.dtype)


# ---------------------------------------------------------------------------
# Wrapper
# ---------------------------------------------------------------------------
def _round_up(x, m):
    return (x + m - 1) // m * m


@functools.partial(jax.jit, static_argnames=("row_tile", "compute_dtype"))
def tds_fc_block(x, fc_w1, fc_b1, fc_w2, fc_b2, ln_g, ln_b, *,
                 row_tile=256, compute_dtype=jnp.bfloat16):
    """TDSFullyConnectedBlock forward.

    x : (T, N, num_features).  Returns (T, N, num_features) in x.dtype.
    fc_w1 / fc_w2 follow the torch.nn.Linear convention: (out, in), y = x @ W^T + b.
    """
    T, N, C = x.shape
    R = T * N
    xr = x.reshape(R, C)

    # Row tiling: multiples of 8 sublanes; pad rows if needed (padded rows are
    # computed but sliced off afterwards — LayerNorm on them stays finite).
    rt = min(row_tile, _round_up(R, 8))
    r_pad = _round_up(R, rt)
    if r_pad != R:
        xr = jnp.pad(xr, ((0, r_pad - R), (0, 0)))

    f32 = jnp.float32
    out = pl.pallas_call(
        _tds_fc_block_kernel,
        out_shape=jax.ShapeDtypeStruct((r_pad, C), x.dtype),
        grid=(r_pad // rt,),
        in_specs=[
            pl.BlockSpec((rt, C), lambda i: (i, 0)),   # activations (tiled rows)
            pl.BlockSpec((C, C), lambda i: (0, 0)),    # W1^T
            pl.BlockSpec((1, C), lambda i: (0, 0)),    # b1
            pl.BlockSpec((C, C), lambda i: (0, 0)),    # W2^T
            pl.BlockSpec((1, C), lambda i: (0, 0)),    # b2
            pl.BlockSpec((1, C), lambda i: (0, 0)),    # LN gamma
            pl.BlockSpec((1, C), lambda i: (0, 0)),    # LN beta
        ],
        out_specs=pl.BlockSpec((rt, C), lambda i: (i, 0)),
        compiler_params=pltpu.CompilerParams(
            dimension_semantics=("parallel",)),        # independent row slabs
    )(
        xr.astype(compute_dtype),
        fc_w1.T.astype(compute_dtype),                 # torch Linear: x @ W^T + b
        fc_b1[None, :].astype(f32),
        fc_w2.T.astype(compute_dtype),
        fc_b2[None, :].astype(f32),
        ln_g[None, :].astype(f32),
        ln_b[None, :].astype(f32),
    )
    return out[:R].reshape(T, N, C)


# ---------------------------------------------------------------------------
# Pure-JAX reference (mirrors the PyTorch forward, f32 end-to-end)
# ---------------------------------------------------------------------------
def tds_fc_block_ref(x, fc_w1, fc_b1, fc_w2, fc_b2, ln_g, ln_b):
    h = jnp.maximum(x @ fc_w1.T + fc_b1, 0.0)
    y = h @ fc_w2.T + fc_b2
    z = y + x
    mu = z.mean(-1, keepdims=True)
    var = ((z - mu) ** 2).mean(-1, keepdims=True)
    return (z - mu) / jnp.sqrt(var + _LN_EPS) * ln_g + ln_b


# ---------------------------------------------------------------------------
# Self-test
# ---------------------------------------------------------------------------
if __name__ == "__main__":
    T, N, C = 64, 8, 128   # (T, N, num_features); C=128 keeps stores lane-dense
    key = jax.random.PRNGKey(0)
    kx, k1, k2, k3, k4, k5, k6 = jax.random.split(key, 7)

    x = jax.random.normal(kx, (T, N, C), jnp.float32)
    fc_w1 = 0.1 * jax.random.normal(k1, (C, C), jnp.float32)
    fc_b1 = 0.1 * jax.random.normal(k2, (C,), jnp.float32)
    fc_w2 = 0.1 * jax.random.normal(k3, (C, C), jnp.float32)
    fc_b2 = 0.1 * jax.random.normal(k4, (C,), jnp.float32)
    ln_g = 1.0 + 0.1 * jax.random.normal(k5, (C,), jnp.float32)
    ln_b = 0.1 * jax.random.normal(k6, (C,), jnp.float32)

    out = tds_fc_block(x, fc_w1, fc_b1, fc_w2, fc_b2, ln_g, ln_b)
    out = jax.block_until_ready(out)

    ref = tds_fc_block_ref(x, fc_w1, fc_b1, fc_w2, fc_b2, ln_g, ln_b)

    assert out.shape == (T, N, C), out.shape
    max_err = float(jnp.max(jnp.abs(out - ref)))
    # bf16 activations/weights with f32 accumulation & f32 LayerNorm => small err.
    assert max_err < 5e-2, f"mismatch vs reference, max_err={max_err}"
    print("KERNEL_OK")
</pallas_src>

<mosaic_0001>
module attributes {stable_mosaic.version = 11 : i64} {
  func.func @_tds_fc_block_kernel(%arg0: i32, %arg1: memref<256x128xbf16, #tpu.memory_space<vmem>>, %arg2: memref<128x128xbf16, #tpu.memory_space<vmem>>, %arg3: memref<1x128xf32, #tpu.memory_space<vmem>>, %arg4: memref<128x128xbf16, #tpu.memory_space<vmem>>, %arg5: memref<1x128xf32, #tpu.memory_space<vmem>>, %arg6: memref<1x128xf32, #tpu.memory_space<vmem>>, %arg7: memref<1x128xf32, #tpu.memory_space<vmem>>, %arg8: memref<256x128xf32, #tpu.memory_space<vmem>>) attributes {dimension_semantics = [#tpu.dimension_semantics<parallel>], iteration_bounds = array<i64: 2>, scalar_prefetch = 0 : i64, scratch_operands = 0 : i64, tpu.core_type = #tpu.core_type<tc>, window_params = [{transform_indices = @transform_0, window_bounds = array<i64: 256, 128>}, {pipeline_mode = #tpu.pipeline_mode<synchronous>, transform_indices = @transform_1, window_bounds = array<i64: 128, 128>}, {pipeline_mode = #tpu.pipeline_mode<synchronous>, transform_indices = @transform_2, window_bounds = array<i64: 1, 128>}, {pipeline_mode = #tpu.pipeline_mode<synchronous>, transform_indices = @transform_3, window_bounds = array<i64: 128, 128>}, {pipeline_mode = #tpu.pipeline_mode<synchronous>, transform_indices = @transform_4, window_bounds = array<i64: 1, 128>}, {pipeline_mode = #tpu.pipeline_mode<synchronous>, transform_indices = @transform_5, window_bounds = array<i64: 1, 128>}, {pipeline_mode = #tpu.pipeline_mode<synchronous>, transform_indices = @transform_6, window_bounds = array<i64: 1, 128>}, {transform_indices = @transform_7, window_bounds = array<i64: 256, 128>}]} {
    %c0 = arith.constant 0 : index
    %c0_0 = arith.constant 0 : index
    %0 = vector.load %arg1[%c0, %c0_0] : memref<256x128xbf16, #tpu.memory_space<vmem>>, vector<256x128xbf16>
    %c0_1 = arith.constant 0 : index
    %c0_2 = arith.constant 0 : index
    %1 = vector.load %arg2[%c0_1, %c0_2] : memref<128x128xbf16, #tpu.memory_space<vmem>>, vector<128x128xbf16>
    %cst = arith.constant dense<0.000000e+00> : vector<256x128xf32>
    %2 = tpu.matmul %0, %1, %cst {dimension_numbers = #tpu.dot_dimension_numbers<[1], [0], [0], [1], [0, 0, 1, 1], [], []>} : vector<256x128xbf16>, vector<128x128xbf16>, vector<256x128xf32> -> vector<256x128xf32>
    %c0_3 = arith.constant 0 : index
    %c0_4 = arith.constant 0 : index
    %3 = vector.load %arg3[%c0_3, %c0_4] : memref<1x128xf32, #tpu.memory_space<vmem>>, vector<1x128xf32>
    %4 = vector.broadcast %3 : vector<1x128xf32> to vector<256x128xf32>
    %5 = arith.addf %2, %4 : vector<256x128xf32>
    %cst_5 = arith.constant 0.000000e+00 : f32
    %6 = vector.broadcast %cst_5 : f32 to vector<256x128xf32>
    %7 = arith.maximumf %5, %6 : vector<256x128xf32>
    %8 = arith.truncf %7 : vector<256x128xf32> to vector<256x128xbf16>
    %c0_6 = arith.constant 0 : index
    %c0_7 = arith.constant 0 : index
    %9 = vector.load %arg4[%c0_6, %c0_7] : memref<128x128xbf16, #tpu.memory_space<vmem>>, vector<128x128xbf16>
    %cst_8 = arith.constant dense<0.000000e+00> : vector<256x128xf32>
    %10 = tpu.matmul %8, %9, %cst_8 {dimension_numbers = #tpu.dot_dimension_numbers<[1], [0], [0], [1], [0, 0, 1, 1], [], []>} : vector<256x128xbf16>, vector<128x128xbf16>, vector<256x128xf32> -> vector<256x128xf32>
    %c0_9 = arith.constant 0 : index
    %c0_10 = arith.constant 0 : index
    %11 = vector.load %arg5[%c0_9, %c0_10] : memref<1x128xf32, #tpu.memory_space<vmem>>, vector<1x128xf32>
    %12 = vector.broadcast %11 : vector<1x128xf32> to vector<256x128xf32>
    %13 = arith.addf %10, %12 : vector<256x128xf32>
    %14 = arith.extf %0 : vector<256x128xbf16> to vector<256x128xf32>
    %15 = arith.addf %13, %14 : vector<256x128xf32>
    %cst_11 = arith.constant dense<0.000000e+00> : vector<256xf32>
    %16 = vector.multi_reduction <add>, %15, %cst_11 [1] : vector<256x128xf32> to vector<256xf32>
    %17 = vector.shape_cast %16 : vector<256xf32> to vector<256x1xf32>
    %cst_12 = arith.constant 1.280000e+02 : f32
    %18 = vector.broadcast %cst_12 : f32 to vector<256x1xf32>
    %19 = arith.divf %17, %18 : vector<256x1xf32>
    %20 = vector.broadcast %19 : vector<256x1xf32> to vector<256x128xf32>
    %21 = arith.subf %15, %20 : vector<256x128xf32>
    %22 = arith.mulf %21, %21 : vector<256x128xf32>
    %cst_13 = arith.constant dense<0.000000e+00> : vector<256xf32>
    %23 = vector.multi_reduction <add>, %22, %cst_13 [1] : vector<256x128xf32> to vector<256xf32>
    %24 = vector.shape_cast %23 : vector<256xf32> to vector<256x1xf32>
    %cst_14 = arith.constant 1.280000e+02 : f32
    %25 = vector.broadcast %cst_14 : f32 to vector<256x1xf32>
    %26 = arith.divf %24, %25 : vector<256x1xf32>
    %27 = vector.broadcast %19 : vector<256x1xf32> to vector<256x128xf32>
    %28 = arith.subf %15, %27 : vector<256x128xf32>
    %cst_15 = arith.constant 9.99999974E-6 : f32
    %29 = vector.broadcast %cst_15 : f32 to vector<256x1xf32>
    %30 = arith.addf %26, %29 : vector<256x1xf32>
    %31 = math.rsqrt %30 : vector<256x1xf32>
    %32 = vector.broadcast %31 : vector<256x1xf32> to vector<256x128xf32>
    %33 = arith.mulf %28, %32 : vector<256x128xf32>
    %c0_16 = arith.constant 0 : index
    %c0_17 = arith.constant 0 : index
    %34 = vector.load %arg6[%c0_16, %c0_17] : memref<1x128xf32, #tpu.memory_space<vmem>>, vector<1x128xf32>
    %35 = vector.broadcast %34 : vector<1x128xf32> to vector<256x128xf32>
    %36 = arith.mulf %33, %35 : vector<256x128xf32>
    %c0_18 = arith.constant 0 : index
    %c0_19 = arith.constant 0 : index
    %37 = vector.load %arg7[%c0_18, %c0_19] : memref<1x128xf32, #tpu.memory_space<vmem>>, vector<1x128xf32>
    %38 = vector.broadcast %37 : vector<1x128xf32> to vector<256x128xf32>
    %39 = arith.addf %36, %38 : vector<256x128xf32>
    %c0_20 = arith.constant 0 : index
    %c0_21 = arith.constant 0 : index
    %40 = vector.load %arg8[%c0_20, %c0_21] : memref<256x128xf32, #tpu.memory_space<vmem>>, vector<256x128xf32>
    tpu.vector_store %arg8[%c0_20, %c0_21], %39 {strides = array<i32>} : memref<256x128xf32, #tpu.memory_space<vmem>>, vector<256x128xf32>,
    return
  }
  func.func @transform_0(%arg0: i32) -> (i32, i32) {
    %c0_i32 = arith.constant 0 : i32
    %c0_i32_0 = arith.constant 0 : i32
    return %arg0, %c0_i32 : i32, i32
  }
  func.func @transform_1(%arg0: i32) -> (i32, i32) {
    %c0_i32 = arith.constant 0 : i32
    %c0_i32_0 = arith.constant 0 : i32
    %c0_i32_1 = arith.constant 0 : i32
    return %c0_i32, %c0_i32_0 : i32, i32
  }
  func.func @transform_2(%arg0: i32) -> (i32, i32) {
    %c0_i32 = arith.constant 0 : i32
    %c0_i32_0 = arith.constant 0 : i32
    %c0_i32_1 = arith.constant 0 : i32
    return %c0_i32, %c0_i32_0 : i32, i32
  }
  func.func @transform_3(%arg0: i32) -> (i32, i32) {
    %c0_i32 = arith.constant 0 : i32
    %c0_i32_0 = arith.constant 0 : i32
    %c0_i32_1 = arith.constant 0 : i32
    return %c0_i32, %c0_i32_0 : i32, i32
  }
  func.func @transform_4(%arg0: i32) -> (i32, i32) {
    %c0_i32 = arith.constant 0 : i32
    %c0_i32_0 = arith.constant 0 : i32
    %c0_i32_1 = arith.constant 0 : i32
    return %c0_i32, %c0_i32_0 : i32, i32
  }
  func.func @transform_5(%arg0: i32) -> (i32, i32) {
    %c0_i32 = arith.constant 0 : i32
    %c0_i32_0 = arith.constant 0 : i32
    %c0_i32_1 = arith.constant 0 : i32
    return %c0_i32, %c0_i32_0 : i32, i32
  }
  func.func @transform_6(%arg0: i32) -> (i32, i32) {
    %c0_i32 = arith.constant 0 : i32
    %c0_i32_0 = arith.constant 0 : i32
    %c0_i32_1 = arith.constant 0 : i32
    return %c0_i32, %c0_i32_0 : i32, i32
  }
  func.func @transform_7(%arg0: i32) -> (i32, i32) {
    %c0_i32 = arith.constant 0 : i32
    %c0_i32_0 = arith.constant 0 : i32
    return %arg0, %c0_i32 : i32, i32
  }
}

</mosaic_0001>

<bundles_post_ra>
// kernel: tds_fc_block.1
= control target key start
LH: loop header
LB: loop body
LE: loop exit
PB: predicated region body
PF: predicated region fallthrough
CT: control target
= control target key end

     0   :  { %12 = vsyncpa [#allocation3], 0  ;;  %s2700_s0 = inlined_call_operand.vmem [shape: bf16[512,128], index: 0, kind: input, shape index: {}]   ;;  %s2701_s1 = inlined_call_operand.vmem [shape: bf16[128,128], index: 1, kind: input, shape index: {}]   ;;  %s2702_s2 = inlined_call_operand.vmem [shape: f32[1,128], index: 2, kind: input, shape index: {}]   ;;  %s2703_s3 = inlined_call_operand.vmem [shape: bf16[128,128], index: 3, kind: input, shape index: {}]   ;;  %s2704_s4 = inlined_call_operand.vmem [shape: f32[1,128], index: 4, kind: input, shape index: {}]   ;;  %s2705_s5 = inlined_call_operand.vmem [shape: f32[1,128], index: 5, kind: input, shape index: {}]   ;;  %s2706_s6 = inlined_call_operand.vmem [shape: f32[1,128], index: 6, kind: input, shape index: {}]   ;;  %s2707_s7 = inlined_call_operand.hbm [shape: f32[512,128], index: 7, kind: output, shape index: {}]  }
   0x1   :  { %14 = vsyncpa [#allocation3 + $0x1], 0  ;;  %s1977_s24 = smov 0   ;;  %s1979_s25 = smov 0  }
   0x2   :  { %s1981_s26 = smov 0   ;;  %s1983_s27 = smov 0  }
   0x3 LB: > { %s1998_s28 = sadd.s32 4294967295, %s1932_s27   ;;  %s1524_s29 = sadd.s32 4294967294, %s1932_s27   ;;  %s1932_s27 = sphi %s1983_s27, %s2713_s27   ;;  %s1928_s26 = sphi %s1981_s26, %s2712_s26   ;;  %s1924_s25 = sphi %s1979_s25, %s2711_s25   ;;  %s1920_s24 = sphi %s1977_s24, %s2710_s24  }
   0x4   : > { %s2002_s30 = sadd.s32 1, %s1932_s27   ;;  %s179_s8 = sadd.s32 1, %s1928_s26 }
   0x5   : > { %s176_s9 = ssub.s32 %s1932_s27, %s2002_s30  ;;  %p189_p0 = scmp.ne.s32.totalorder %s1928_s26, %s1924_s25 }
   0x6   : > { %p177_p1 = scmp.eq.s32.totalorder %s176_s9, 0  ;;  %p190_p2 = scmp.eq.s32.totalorder %s1998_s28, 1 }
   0x7   : > { %p195_p3 = scmp.ne.s32.totalorder %s1924_s25, %s1920_s24  ;;  %p196_p4 = scmp.eq.s32.totalorder %s1524_s29, 1 }
   0x8   : > { %s2013_s10 = scalar_select %p177_p1, %s1928_s26, %s179_s8  }
   0x9   : > { %p2015_p5 = por %p190_p2, %p189_p0  ;;  %p2019_p6 = por %p196_p4, %p195_p3 }
   0xa   : > { %p1527_p7 = scmp.ge.s32.totalorder %s1932_s27, 1  ;;  %p241_p8 = scmp.lt.s32.totalorder %s1932_s27, 3 }
   0xc   : > { %p242_p9 = pnand %p1527_p7, %p241_p8 }
   0xd   : > { %v1758_v0 = vld [vmem:[%s2701_s1] sm:$0xff] (!%p242_p9)   ;;  %s1529_s15 = sshll.u32 (!%p242_p9), %s1998_s28, 5  ;;  %v1759_v1 = vld [vmem:[%s2701_s1 + $0x8] sm:$0xff] (!%p242_p9)   ;;  %v1760_v2 = vld [vmem:[%s2701_s1 + $0x10] sm:$0xff] (!%p242_p9)   ;;  %s270_s13 = sand.u32 (!%p242_p9), 1, %s1924_s25  }
   0xe   : > { %245 = sbr.rel (%p242_p9) target bundleno = 874 (0x36a), region = 48  ;;  %p274_p10 = scmp.lt.s32.totalorder (!%p242_p9), %s1529_s15, 63  ;;  %1621 = vmatprep.subr.bf16.mxu0 (!%p242_p9), %v1758_v0  ;;  %v1761_v3 = vld [vmem:[%s2701_s1 + $0x18] sm:$0xff] (!%p242_p9)   ;;  %v1762_v5 = vld [vmem:[%s2701_s1 + $0x20] sm:$0xff] (!%p242_p9)   ;;  %v1783_v7 = vld [vmem:[%s2703_s3 + $0x8] sm:$0xff] (!%p242_p9)  }
   0xf   : > { %1622 = vmatpush3.bf16.msra.mxu0 (!%p242_p9), %v1758_v0  ;;  %v1782_v6 = vld [vmem:[%s2703_s3] sm:$0xff] (!%p242_p9)   ;;  %v1763_v8 = vld [vmem:[%s2701_s1 + $0x28] sm:$0xff] (!%p242_p9)   ;;  %v1784_v9 = vld [vmem:[%s2703_s3 + $0x10] sm:$0xff] (!%p242_p9)   ;;  %s1528_s16 = sshll.u32 (!%p242_p9), %s270_s13, 8  ;;  %s1934_s9 = smov (!%p242_p9), [#allocation2]  }
  0x10   : > { %1623 = vmatprep.subr.bf16.mxu0 (!%p242_p9), %v1759_v1  ;;  %1669 = vmatprep.subr.bf16.mxu1 (!%p242_p9), %v1782_v6  ;;  %v1764_v10 = vld [vmem:[%s2701_s1 + $0x30] sm:$0xff] (!%p242_p9)   ;;  %v1785_v11 = vld [vmem:[%s2703_s3 + $0x18] sm:$0xff] (!%p242_p9)   ;;  %v1786_v13 = vld [vmem:[%s2703_s3 + $0x20] sm:$0xff] (!%p242_p9)   ;;  %s2523_s19 = scalar_lea.vmem (!%p242_p9), [#allocation2], %s1528_s16  ;;  %s1874_s14 = sshll.u32 (!%p242_p9), %s1934_s9, 4  ;;  %s1875_s14 = int_to_ptr.vmem [resolvable:$false] %s1874_s14 }
  0x11   : > { %1670 = vmatpush3.bf16.msra.mxu1 (!%p242_p9), %v1782_v6  ;;  %v1765_v12 = vld [vmem:[%s2701_s1 + $0x38] sm:$0xff] (!%p242_p9)   ;;  %v1787_v16 = vld [vmem:[%s2703_s3 + $0x28] sm:$0xff] (!%p242_p9)   ;;  %v1788_v30 = vld [vmem:[%s2703_s3 + $0x30] sm:$0xff] (!%p242_p9)   ;;  %s1462_s21 = sshll.u32 (!%p242_p9), %s2523_s19, 4  ;;  %s2653_s21 = int_to_ptr.vmem [resolvable:$true] %s1462_s21 }
  0x12   : > { %1671 = vmatprep.subr.bf16.mxu1 (!%p242_p9), %v1783_v7  ;;  %v1789_v31 = vld [vmem:[%s2703_s3 + $0x38] sm:$0xff] (!%p242_p9)   ;;  %v2146_v32 = vld [vmem:[%s2702_s2] ss:$0 sm:$0xff] (!%p242_p9)  ;;  %p1877_p0 = scmp.lt.s32.totalorder (!%p242_p9), %s2653_s21, %s1875_s14 }
  0x13   : > { %1624 = vmatpush3.bf16.msra.mxu0 (!%p242_p9), %v1759_v1 }
  0x14   : > { %1625 = vmatprep.subr.bf16.mxu0 (!%p242_p9), %v1760_v2 }
  0x15   : > { %s2715_s15 = smov (!%p274_p10, %s1529_s15), 63  ;;  %1672 = vmatpush3.bf16.msra.mxu1 %v1783_v7 }
  0x16   : > { %s1530_s20 = sshll.u32 %s2715_s15, 2  ;;  %1673 = vmatprep.subr.bf16.mxu1 %v1784_v9  ;;  %s1876_s15 = scalar_lea.vmem %s1875_s14, 8192 }
  0x17   : > { %s2038_s23 = scalar_lea.vmem %s2700_s0, %s1530_s20  ;;  %1626 = vmatpush3.bf16.msra.mxu0 %v1760_v2  ;;  %s1572_s20 = sshll.u32 %s1998_s28, 12 }
  0x18   : > { %v2044_v4 = vld [vmem:[%s2038_s23] sm:$0xff]   ;;  %1627 = vmatprep.subr.bf16.mxu0 %v1761_v3  ;;  %v2075_v14 = vld [vmem:[%s2038_s23 + $0x8] sm:$0xff]   ;;  %v2078_v15 = vld [vmem:[%s2038_s23 + $0x10] sm:$0xff]   ;;  %s2651_s8 = scalar_lea.hbm %s2707_s7, %s1572_s20  ;;  %s2659_s28 = scalar_lea.sflag [#allocation3], %s270_s13 }
  0x19   : > { %1637 = vmatprep.mubr.bf16.mxu0 %v2044_v4  ;;  %1674 = vmatpush3.bf16.msra.mxu1 %v1784_v9  ;;  %v2086_v17 = vld [vmem:[%s2038_s23 + $0x18] sm:$0xff]   ;;  %v2089_v18 = vld [vmem:[%s2038_s23 + $0x20] sm:$0xff]   ;;  %v2094_v19 = vld [vmem:[%s2038_s23 + $0x28] sm:$0xff]  }
  0x1a   : > { %1675 = vmatprep.subr.bf16.mxu1 %v1785_v11  ;;  %v2097_v20 = vld [vmem:[%s2038_s23 + $0x30] sm:$0xff]   ;;  %v2102_v21 = vld [vmem:[%s2038_s23 + $0x38] sm:$0xff]   ;;  %v2105_v22 = vld [vmem:[%s2038_s23 + $0x40] sm:$0xff]  }
  0x1b   : > { %1628 = vmatpush3.bf16.msra.mxu0 %v1761_v3  ;;  %v2110_v23 = vld [vmem:[%s2038_s23 + $0x48] sm:$0xff]   ;;  %v2113_v24 = vld [vmem:[%s2038_s23 + $0x50] sm:$0xff]   ;;  %v2118_v25 = vld [vmem:[%s2038_s23 + $0x58] sm:$0xff]  }
  0x1c   : > { %1629 = vmatprep.subr.bf16.mxu0 %v1762_v5  ;;  %v2121_v26 = vld [vmem:[%s2038_s23 + $0x60] sm:$0xff]   ;;  %v2126_v27 = vld [vmem:[%s2038_s23 + $0x68] sm:$0xff]   ;;  %v2129_v28 = vld [vmem:[%s2038_s23 + $0x70] sm:$0xff]  }
  0x1d   : > { %1676 = vmatpush3.bf16.msra.mxu1 %v1785_v11  ;;  %v2134_v29 = vld [vmem:[%s2038_s23 + $0x78] sm:$0xff]   ;;  %s1870_s23 = scalar_lea.vmem %s2653_s21, 4096 }
  0x1e   : > { %1677 = vmatprep.subr.bf16.mxu1 %v1786_v13  ;;  %p1871_p11 = scmp.ne.s32.totalorder %s2653_s21, %s1870_s23  ;;  %p1878_p1 = scmp.lt.s32.totalorder %s1876_s15, %s1870_s23 }
  0x1f   : > { %1630 = vmatpush3.bf16.msra.mxu0 %v1762_v5 }
  0x20   : > { %1631 = vmatprep.subr.bf16.mxu0 %v1763_v8  ;;  %p1872_p12 = pnand %p1871_p11, %p2015_p5  ;;  %p1879_p2 = por %p1878_p1, %p1877_p0 }
  0x21   : > { %1678 = vmatpush3.bf16.msra.mxu1 %v1786_v13 }
  0x22   : > { %1679 = vmatprep.subr.bf16.mxu1 %v1787_v16  ;;  %p1873_p13 = pneg %p1872_p12 }
  0x23   : > { %1632 = vmatpush3.bf16.msra.mxu0 %v1763_v8 }
  0x24   : > { %1633 = vmatprep.subr.bf16.mxu0 %v1764_v10  ;;  %p1880_p3 = pnand %p1879_p2, %p1873_p13 }
  0x25   : > { %1680 = vmatpush3.bf16.msra.mxu1 %v1787_v16 }
  0x26   : > { %1681 = vmatprep.subr.bf16.mxu1 %v1788_v30 }
  0x27   : > { %1634 = vmatpush3.bf16.msra.mxu0 %v1764_v10 }
  0x28   : > { %1635 = vmatprep.subr.bf16.mxu0 %v1765_v12 }
  0x29   : > { %1682 = vmatpush3.bf16.msra.mxu1 %v1788_v30 }
  0x2a   : > { %1683 = vmatprep.subr.bf16.mxu1 %v1789_v31 }
  0x2b   : > { %1636 = vmatpush3.bf16.msra.mxu0 %v1765_v12 }
  0x2d   : > { %1684 = vmatpush3.bf16.msra.mxu1 %v1789_v31 }
  0x2e   : > { %1638 = vmatmul.mubr.bf16.vlgmr.msra.gmra.mrb[0].mxu0 %v2075_v14 }
  0x2f   : > { %1641 = vmatprep.mubr.bf16.mxu0 %v2078_v15 }
  0x36   : > { %1642 = vmatmul.mubr.bf16.gmra.mrb[4].mxu0 %v2086_v17 }
  0x37   : > { %1645 = vmatprep.mubr.bf16.mxu0 %v2089_v18 }
  0x3e   : > { %1646 = vmatmul.mubr.bf16.gmra.mrb[8].mxu0 %v2094_v19 }
  0x3f   : > { %1649 = vmatprep.mubr.bf16.mxu0 %v2097_v20 }
  0x46   : > { %1650 = vmatmul.mubr.bf16.gmra.mrb[12].mxu0 %v2102_v21 }
  0x47   : > { %1653 = vmatprep.mubr.bf16.mxu0 %v2105_v22 }
  0x4e   : > { %1654 = vmatmul.mubr.bf16.gmra.mrb[16].mxu0 %v2110_v23 }
  0x4f   : > { %1657 = vmatprep.mubr.bf16.mxu0 %v2113_v24 }
  0x56   : > { %1658 = vmatmul.mubr.bf16.gmra.mrb[20].mxu0 %v2118_v25 }
  0x57   : > { %1661 = vmatprep.mubr.bf16.mxu0 %v2121_v26 }
  0x5e   : > { %1662 = vmatmul.mubr.bf16.gmra.mrb[24].mxu0 %v2126_v27 }
  0x5f   : > { %1665 = vmatprep.mubr.bf16.mxu0 %v2129_v28 }
  0x66   : > { %1666 = vmatmul.mubr.bf16.gmra.mrb[28].mxu0 %v2134_v29 }
 0x101   : > { %v1639_v33 = vpop.f32.mrb[0].mxu0 }
 0x102   : > { %v523_v34 = vadd.f32 %v1639_v33, %v2146_v32  ;;  %v514_v35 = vpop.f32.mrb[1].mxu0 }
 0x103   : > { %v515_v36 = vadd.f32 %v2146_v32, %v514_v35  ;;  %v1640_v37 = vpop.f32.mrb[2].mxu0 }
 0x104   : > { %v526_v38 = vadd.f32 %v1640_v37, %v2146_v32  ;;  %v517_v39 = vpop.f32.mrb[3].mxu0  ;;  %v643_v41 = vmax.f32 %v523_v34, 0.0 }
 0x105   : > { %v518_v40 = vadd.f32 %v2146_v32, %v517_v39  ;;  %v641_v43 = vmax.f32 %v515_v36, 0.0 }
 0x106   : > { %v644_v42 = vmax.f32 %v526_v38, 0.0 }
 0x107   : > { %v642_v44 = vmax.f32 %v518_v40, 0.0 }
 0x108   : > { %v674_v45 = vpack.c.bf16 %v644_v42, %v643_v41 }
 0x109   : > { %v1643_v46 = vpop.f32.mrb[4].mxu0  ;;  %v673_v47 = vpack.c.bf16 %v642_v44, %v641_v43 }
 0x10a   : > { %v539_v48 = vadd.f32 %v1643_v46, %v2146_v32  ;;  %v530_v49 = vpop.f32.mrb[5].mxu0 }
 0x10b   : > { %v531_v50 = vadd.f32 %v2146_v32, %v530_v49  ;;  %v1644_v51 = vpop.f32.mrb[6].mxu0  ;;  %1685 = vmatprep.mubr.bf16.mxu1 %v673_v47 }
 0x10c   : > { %v647_v52 = vmax.f32 %v539_v48, 0.0  ;;  %v542_v53 = vadd.f32 %v1644_v51, %v2146_v32  ;;  %v533_v54 = vpop.f32.mrb[7].mxu0  ;;  %1686 = vmatmul.mubr.bf16.vlgmr.msra.gmra.mrb[0].mxu1 %v674_v45 }
 0x10d   : > { %v534_v55 = vadd.f32 %v2146_v32, %v533_v54  ;;  %v645_v57 = vmax.f32 %v531_v50, 0.0 }
 0x10e   : > { %v648_v56 = vmax.f32 %v542_v53, 0.0 }
 0x10f   : > { %v646_v58 = vmax.f32 %v534_v55, 0.0 }
 0x110   : > { %v676_v59 = vpack.c.bf16 %v648_v56, %v647_v52 }
 0x111   : > { %v675_v60 = vpack.c.bf16 %v646_v58, %v645_v57  ;;  %v1647_v61 = vpop.f32.mrb[8].mxu0 }
 0x112   : > { %v555_v62 = vadd.f32 %v1647_v61, %v2146_v32  ;;  %v546_v63 = vpop.f32.mrb[9].mxu0 }
 0x113   : > { %v547_v0 = vadd.f32 %v2146_v32, %v546_v63  ;;  %v1648_v1 = vpop.f32.mrb[10].mxu0  ;;  %1689 = vmatprep.mubr.bf16.mxu1 %v675_v60 }
 0x114   : > { %v651_v2 = vmax.f32 %v555_v62, 0.0  ;;  %v558_v3 = vadd.f32 %v1648_v1, %v2146_v32  ;;  %v549_v5 = vpop.f32.mrb[11].mxu0  ;;  %1690 = vmatmul.mubr.bf16.gmra.mrb[4].mxu1 %v676_v59 }
 0x115   : > { %v550_v6 = vadd.f32 %v2146_v32, %v549_v5  ;;  %v649_v8 = vmax.f32 %v547_v0, 0.0 }
 0x116   : > { %v652_v7 = vmax.f32 %v558_v3, 0.0 }
 0x117   : > { %v650_v9 = vmax.f32 %v550_v6, 0.0 }
 0x118   : > { %v678_v10 = vpack.c.bf16 %v652_v7, %v651_v2 }
 0x119   : > { %v677_v11 = vpack.c.bf16 %v650_v9, %v649_v8  ;;  %v1651_v12 = vpop.f32.mrb[12].mxu0 }
 0x11a   : > { %v571_v13 = vadd.f32 %v1651_v12, %v2146_v32  ;;  %v562_v16 = vpop.f32.mrb[13].mxu0 }
 0x11b   : > { %v563_v30 = vadd.f32 %v2146_v32, %v562_v16  ;;  %v1652_v31 = vpop.f32.mrb[14].mxu0  ;;  %1693 = vmatprep.mubr.bf16.mxu1 %v677_v11 }
 0x11c   : > { %v655_v33 = vmax.f32 %v571_v13, 0.0  ;;  %v574_v34 = vadd.f32 %v1652_v31, %v2146_v32  ;;  %v565_v35 = vpop.f32.mrb[15].mxu0  ;;  %1694 = vmatmul.mubr.bf16.gmra.mrb[8].mxu1 %v678_v10 }
 0x11d   : > { %v566_v36 = vadd.f32 %v2146_v32, %v565_v35  ;;  %v653_v38 = vmax.f32 %v563_v30, 0.0 }
 0x11e   : > { %v656_v37 = vmax.f32 %v574_v34, 0.0 }
 0x11f   : > { %v654_v39 = vmax.f32 %v566_v36, 0.0 }
 0x120   : > { %v680_v40 = vpack.c.bf16 %v656_v37, %v655_v33 }
 0x121   : > { %v679_v41 = vpack.c.bf16 %v654_v39, %v653_v38  ;;  %v1655_v42 = vpop.f32.mrb[16].mxu0 }
 0x122   : > { %v587_v43 = vadd.f32 %v1655_v42, %v2146_v32  ;;  %v578_v44 = vpop.f32.mrb[17].mxu0 }
 0x123   : > { %v579_v45 = vadd.f32 %v2146_v32, %v578_v44  ;;  %v1656_v46 = vpop.f32.mrb[18].mxu0  ;;  %1697 = vmatprep.mubr.bf16.mxu1 %v679_v41 }
 0x124   : > { %v659_v47 = vmax.f32 %v587_v43, 0.0  ;;  %v590_v48 = vadd.f32 %v1656_v46, %v2146_v32  ;;  %v581_v49 = vpop.f32.mrb[19].mxu0  ;;  %1698 = vmatmul.mubr.bf16.gmra.mrb[12].mxu1 %v680_v40 }
 0x125   : > { %v582_v50 = vadd.f32 %v2146_v32, %v581_v49  ;;  %v657_v52 = vmax.f32 %v579_v45, 0.0 }
 0x126   : > { %v660_v51 = vmax.f32 %v590_v48, 0.0 }
 0x127   : > { %v658_v53 = vmax.f32 %v582_v50, 0.0 }
 0x128   : > { %v682_v54 = vpack.c.bf16 %v660_v51, %v659_v47  ;;  %v2183_v51 = vld [vmem:[%s2704_s4] ss:$0 sm:$0xff] }
 0x129   : > { %v681_v55 = vpack.c.bf16 %v658_v53, %v657_v52  ;;  %v1659_v56 = vpop.f32.mrb[20].mxu0  ;;  %v923_v52 = vunpack.c.l.bf16 %v2075_v14  ;;  %v921_v53 = vunpack.c.l.bf16 %v2044_v4 }
 0x12a   : > { %v603_v57 = vadd.f32 %v1659_v56, %v2146_v32  ;;  %v594_v58 = vpop.f32.mrb[21].mxu0  ;;  %v922_v56 = vunpack.c.h.bf16 %v2044_v4 }
 0x12b   : > { %v595_v59 = vadd.f32 %v2146_v32, %v594_v58  ;;  %v1660_v60 = vpop.f32.mrb[22].mxu0  ;;  %1701 = vmatprep.mubr.bf16.mxu1 %v681_v55 }
 0x12c   : > { %v663_v61 = vmax.f32 %v603_v57, 0.0  ;;  %v606_v62 = vadd.f32 %v1660_v60, %v2146_v32  ;;  %v597_v63 = vpop.f32.mrb[23].mxu0  ;;  %1702 = vmatmul.mubr.bf16.gmra.mrb[16].mxu1 %v682_v54 }
 0x12d   : > { %v598_v0 = vadd.f32 %v2146_v32, %v597_v63  ;;  %v661_v2 = vmax.f32 %v595_v59, 0.0 }
 0x12e   : > { %v664_v1 = vmax.f32 %v606_v62, 0.0  ;;  %v924_v62 = vunpack.c.h.bf16 %v2075_v14 }
 0x12f   : > { %v662_v3 = vmax.f32 %v598_v0, 0.0 }
 0x130   : > { %v684_v5 = vpack.c.bf16 %v664_v1, %v663_v61 }
 0x131   : > { %v683_v6 = vpack.c.bf16 %v662_v3, %v661_v2  ;;  %v1663_v7 = vpop.f32.mrb[24].mxu0  ;;  %v927_v2 = vunpack.c.l.bf16 %v2086_v17 }
 0x132   : > { %v619_v8 = vadd.f32 %v1663_v7, %v2146_v32  ;;  %v610_v9 = vpop.f32.mrb[25].mxu0 }
 0x133   : > { %v611_v10 = vadd.f32 %v2146_v32, %v610_v9  ;;  %v1664_v11 = vpop.f32.mrb[26].mxu0  ;;  %1705 = vmatprep.mubr.bf16.mxu1 %v683_v6  ;;  %v928_v6 = vunpack.c.h.bf16 %v2086_v17  ;;  %v931_v17 = vunpack.c.l.bf16 %v2094_v19 }
 0x134   : > { %v667_v12 = vmax.f32 %v619_v8, 0.0  ;;  %v622_v13 = vadd.f32 %v1664_v11, %v2146_v32  ;;  %v613_v16 = vpop.f32.mrb[27].mxu0  ;;  %1706 = vmatmul.mubr.bf16.gmra.mrb[20].mxu1 %v684_v5 }
 0x135   : > { %v614_v30 = vadd.f32 %v2146_v32, %v613_v16  ;;  %v665_v33 = vmax.f32 %v611_v10, 0.0 }
 0x136   : > { %v668_v31 = vmax.f32 %v622_v13, 0.0 }
 0x137   : > { %v666_v34 = vmax.f32 %v614_v30, 0.0  ;;  %v926_v30 = vunpack.c.h.bf16 %v2078_v15 }
 0x138   : > { %v686_v35 = vpack.c.bf16 %v668_v31, %v667_v12  ;;  %v925_v12 = vunpack.c.l.bf16 %v2078_v15 }
 0x139   : > { %v685_v36 = vpack.c.bf16 %v666_v34, %v665_v33  ;;  %v1667_v37 = vpop.f32.mrb[28].mxu0 }
 0x13a   : > { %v635_v38 = vadd.f32 %v1667_v37, %v2146_v32  ;;  %v626_v39 = vpop.f32.mrb[29].mxu0  ;;  %v932_v37 = vunpack.c.h.bf16 %v2094_v19  ;;  %v930_v19 = vunpack.c.h.bf16 %v2089_v18 }
 0x13b   : > { %v627_v40 = vadd.f32 %v2146_v32, %v626_v39  ;;  %v1668_v41 = vpop.f32.mrb[30].mxu0  ;;  %1709 = vmatprep.mubr.bf16.mxu1 %v685_v36 }
 0x13c   : > { %v671_v42 = vmax.f32 %v635_v38, 0.0  ;;  %v638_v43 = vadd.f32 %v1668_v41, %v2146_v32  ;;  %v629_v44 = vpop.f32.mrb[31].mxu0  ;;  %1710 = vmatmul.mubr.bf16.gmra.mrb[24].mxu1 %v686_v35 }
 0x13d   : > { %v630_v45 = vadd.f32 %v2146_v32, %v629_v44  ;;  %v669_v47 = vmax.f32 %v627_v40, 0.0 }
 0x13e   : > { %v672_v46 = vmax.f32 %v638_v43, 0.0 }
 0x13f   : > { %v670_v48 = vmax.f32 %v630_v45, 0.0  ;;  %v935_v45 = vunpack.c.l.bf16 %v2102_v21 }
 0x140   : > { %v688_v49 = vpack.c.bf16 %v672_v46, %v671_v42  ;;  %v929_v42 = vunpack.c.l.bf16 %v2089_v18 }
 0x141   : > { %v687_v50 = vpack.c.bf16 %v670_v48, %v669_v47 }
 0x143   : > { %1713 = vmatprep.mubr.bf16.mxu1 %v687_v50 }
 0x144   : > { %1714 = vmatmul.mubr.bf16.gmra.mrb[28].mxu1 %v688_v49 }
 0x1df   : > { %v1687_v54 = vpop.f32.mrb[0].mxu1 }
 0x1e0   : > { %v803_v55 = vadd.f32 %v1687_v54, %v2183_v51  ;;  %v794_v32 = vpop.f32.mrb[1].mxu1 }
 0x1e1   : > { %v795_v57 = vadd.f32 %v2183_v51, %v794_v32  ;;  %v1688_v58 = vpop.f32.mrb[2].mxu1 }
 0x1e2   : > { %v806_v59 = vadd.f32 %v1688_v58, %v2183_v51  ;;  %v797_v60 = vpop.f32.mrb[3].mxu1  ;;  %v2191_v61 = vadd.f32 %v923_v52, %v803_v55  ;;  %v936_v52 = vunpack.c.h.bf16 %v2102_v21  ;;  %v934_v21 = vunpack.c.h.bf16 %v2097_v20 }
 0x1e3   : > { %v798_v63 = vadd.f32 %v2183_v51, %v797_v60  ;;  %v2195_v0 = vadd.f32 %v921_v53, %v795_v57 }
 0x1e4   : > { %989 = vadd.xlane.f32.xlu1 %v2191_v61  ;;  %v2201_v4 = vadd.f32 %v924_v62, %v806_v59  ;;  %v939_v59 = vunpack.c.l.bf16 %v2110_v23 }
 0x1e5   : > { %985 = vadd.xlane.f32.xlu0 %v2195_v0  ;;  %v2199_v1 = vadd.f32 %v922_v56, %v798_v63  ;;  %v933_v56 = vunpack.c.l.bf16 %v2097_v20 }
 0x1e7   : > { %v1691_v3 = vpop.f32.mrb[4].mxu1 }
 0x1e8   : > { %v819_v5 = vadd.f32 %v1691_v3, %v2183_v51  ;;  %991 = vadd.xlane.f32.xlu1 %v2201_v4  ;;  %v810_v14 = vpop.f32.mrb[5].mxu1 }
 0x1e9   : > { %v1692_v7 = vpop.f32.mrb[6].mxu1  ;;  %987 = vadd.xlane.f32.xlu0 %v2199_v1  ;;  %v811_v11 = vadd.f32 %v2183_v51, %v810_v14 }
 0x1ea   : > { %v822_v8 = vadd.f32 %v1692_v7, %v2183_v51  ;;  %v813_v9 = vpop.f32.mrb[7].mxu1  ;;  %v2209_v10 = vadd.f32 %v927_v2, %v819_v5  ;;  %v940_v5 = vunpack.c.h.bf16 %v2110_v23  ;;  %v938_v23 = vunpack.c.h.bf16 %v2105_v22 }
 0x1eb   : > { %v814_v13 = vadd.f32 %v2183_v51, %v813_v9  ;;  %v2220_v33 = vadd.f32 %v925_v12, %v811_v11  ;;  %v937_v9 = vunpack.c.l.bf16 %v2105_v22 }
 0x1ec   : > { %v2214_v16 = vadd.f32 %v928_v6, %v822_v8 }
 0x1ed   : > { %997 = vadd.xlane.f32.xlu0 %v2209_v10  ;;  %v2223_v36 = vadd.f32 %v926_v30, %v814_v13  ;;  %v943_v13 = vunpack.c.l.bf16 %v2118_v25 }
 0x1ee   : > { %999 = vadd.xlane.f32.xlu1 %v2214_v16 }
 0x1ef   : > { %v1695_v31 = vpop.f32.mrb[8].mxu1 }
 0x1f0   : > { %v835_v34 = vadd.f32 %v1695_v31, %v2183_v51  ;;  %v826_v35 = vpop.f32.mrb[9].mxu1 }
 0x1f1   : > { %v1696_v38 = vpop.f32.mrb[10].mxu1  ;;  %993 = vadd.xlane.f32.xlu0 %v2220_v33  ;;  %v827_v41 = vadd.f32 %v2183_v51, %v826_v35 }
 0x1f2   : > { %v838_v15 = vadd.f32 %v1696_v38, %v2183_v51  ;;  %v829_v39 = vpop.f32.mrb[11].mxu1  ;;  %995 = vadd.xlane.f32.xlu1 %v2223_v36  ;;  %v2229_v40 = vadd.f32 %v931_v17, %v835_v34 }
 0x1f3   : > { %v830_v43 = vadd.f32 %v2183_v51, %v829_v39  ;;  %v2240_v47 = vadd.f32 %v929_v42, %v827_v41  ;;  %v941_v42 = vunpack.c.l.bf16 %v2113_v24 }
 0x1f4   : > { %v2234_v44 = vadd.f32 %v932_v37, %v838_v15  ;;  %v944_v37 = vunpack.c.h.bf16 %v2118_v25  ;;  %v942_v25 = vunpack.c.h.bf16 %v2113_v24 }
 0x1f5   : > { %1005 = vadd.xlane.f32.xlu0 %v2229_v40  ;;  %v2243_v50 = vadd.f32 %v930_v19, %v830_v43 }
 0x1f6   : > { %1007 = vadd.xlane.f32.xlu1 %v2234_v44 }
 0x1f7   : > { %v1699_v46 = vpop.f32.mrb[12].mxu1 }
 0x1f8   : > { %v851_v48 = vadd.f32 %v1699_v46, %v2183_v51  ;;  %v842_v49 = vpop.f32.mrb[13].mxu1 }
 0x1f9   : > { %v1700_v53 = vpop.f32.mrb[14].mxu1  ;;  %1001 = vadd.xlane.f32.xlu0 %v2240_v47  ;;  %v843_v32 = vadd.f32 %v2183_v51, %v842_v49 }
 0x1fa   : > { %v854_v18 = vadd.f32 %v1700_v53, %v2183_v51  ;;  %v845_v54 = vpop.f32.mrb[15].mxu1  ;;  %1003 = vadd.xlane.f32.xlu1 %v2243_v50  ;;  %v2249_v55 = vadd.f32 %v935_v45, %v851_v48  ;;  %v947_v45 = vunpack.c.l.bf16 %v2126_v27 }
 0x1fb   : > { %v846_v57 = vadd.f32 %v2183_v51, %v845_v54  ;;  %v2260_v62 = vadd.f32 %v933_v56, %v843_v32 }
 0x1fc   : > { %v2254_v58 = vadd.f32 %v936_v52, %v854_v18  ;;  %v948_v18 = vunpack.c.h.bf16 %v2126_v27  ;;  %v946_v27 = vunpack.c.h.bf16 %v2121_v26 }
 0x1fd   : > { %1013 = vadd.xlane.f32.xlu0 %v2249_v55  ;;  %v2263_v3 = vadd.f32 %v934_v21, %v846_v57  ;;  %v945_v21 = vunpack.c.l.bf16 %v2121_v26 }
 0x1fe   : > { %1015 = vadd.xlane.f32.xlu1 %v2254_v58 }
 0x1ff   : > { %v1703_v60 = vpop.f32.mrb[16].mxu1 }
 0x200   : > { %v867_v63 = vadd.f32 %v1703_v60, %v2183_v51  ;;  %v858_v2 = vpop.f32.mrb[17].mxu1 }
 0x201   : > { %v1704_v14 = vpop.f32.mrb[18].mxu1  ;;  %1009 = vadd.xlane.f32.xlu0 %v2260_v62  ;;  %v859_v8 = vadd.f32 %v2183_v51, %v858_v2 }
 0x202   : > { %v870_v20 = vadd.f32 %v1704_v14, %v2183_v51  ;;  %v861_v6 = vpop.f32.mrb[19].mxu1  ;;  %1011 = vadd.xlane.f32.xlu1 %v2263_v3  ;;  %v2269_v7 = vadd.f32 %v939_v59, %v867_v63 }
 0x203   : > { %v862_v11 = vadd.f32 %v2183_v51, %v861_v6  ;;  %v2280_v17 = vadd.f32 %v937_v9, %v859_v8  ;;  %v950_v9 = vunpack.c.h.bf16 %v2129_v28 }
 0x204   : > { %v2274_v12 = vadd.f32 %v940_v5, %v870_v20  ;;  %v949_v5 = vunpack.c.l.bf16 %v2129_v28 }
 0x205   : > { %1021 = vadd.xlane.f32.xlu0 %v2269_v7  ;;  %v2283_v35 = vadd.f32 %v938_v23, %v862_v11 }
 0x206   : > { %1023 = vadd.xlane.f32.xlu1 %v2274_v12 }
 0x207   : > { %v1707_v30 = vpop.f32.mrb[20].mxu1 }
 0x208   : > { %v883_v31 = vadd.f32 %v1707_v30, %v2183_v51  ;;  %v874_v34 = vpop.f32.mrb[21].mxu1  ;;  %v951_v30 = vunpack.c.l.bf16 %v2134_v29 }
 0x209   : > { %v1708_v38 = vpop.f32.mrb[22].mxu1  ;;  %1017 = vadd.xlane.f32.xlu0 %v2280_v17  ;;  %v875_v41 = vadd.f32 %v2183_v51, %v874_v34 }
 0x20a   : > { %v886_v22 = vadd.f32 %v1708_v38, %v2183_v51  ;;  %v877_v15 = vpop.f32.mrb[23].mxu1  ;;  %1019 = vadd.xlane.f32.xlu1 %v2283_v35  ;;  %v2289_v39 = vadd.f32 %v943_v13, %v883_v31 }
 0x20b   : > { %v878_v43 = vadd.f32 %v2183_v51, %v877_v15  ;;  %v2300_v48 = vadd.f32 %v941_v42, %v875_v41 }
 0x20c   : > { %v2294_v19 = vadd.f32 %v944_v37, %v886_v22  ;;  %v952_v37 = vunpack.c.h.bf16 %v2134_v29 }
 0x20d   : > { %1029 = vadd.xlane.f32.xlu0 %v2289_v39  ;;  %v2303_v53 = vadd.f32 %v942_v25, %v878_v43 }
 0x20e   : > { %1031 = vadd.xlane.f32.xlu1 %v2294_v19 }
 0x20f   : > { %v1711_v46 = vpop.f32.mrb[24].mxu1 }
 0x210   : > { %v899_v49 = vadd.f32 %v1711_v46, %v2183_v51  ;;  %v890_v52 = vpop.f32.mrb[25].mxu1 }
 0x211   : > { %v1712_v54 = vpop.f32.mrb[26].mxu1  ;;  %1025 = vadd.xlane.f32.xlu0 %v2300_v48  ;;  %v891_v57 = vadd.f32 %v2183_v51, %v890_v52 }
 0x212   : > { %v902_v24 = vadd.f32 %v1712_v54, %v2183_v51  ;;  %v893_v32 = vpop.f32.mrb[27].mxu1  ;;  %1027 = vadd.xlane.f32.xlu1 %v2303_v53  ;;  %v2309_v56 = vadd.f32 %v947_v45, %v899_v49 }
 0x213   : > { %v894_v59 = vadd.f32 %v2183_v51, %v893_v32  ;;  %v2319_v2 = vadd.f32 %v945_v21, %v891_v57 }
 0x214   : > { %v2314_v60 = vadd.f32 %v948_v18, %v902_v24 }
 0x215   : > { %1037 = vadd.xlane.f32.xlu0 %v2309_v56  ;;  %v2322_v20 = vadd.f32 %v946_v27, %v894_v59 }
 0x216   : > { %1039 = vadd.xlane.f32.xlu1 %v2314_v60 }
 0x217   : > { %v1715_v63 = vpop.f32.mrb[28].mxu1 }
 0x218   : > { %v906_v14 = vpop.f32.mrb[29].mxu1  ;;  %v915_v11 = vadd.f32 %v1715_v63, %v2183_v51 }
 0x219   : > { %v907_v6 = vadd.f32 %v2183_v51, %v906_v14  ;;  %v1716_v8 = vpop.f32.mrb[30].mxu1  ;;  %1033 = vadd.xlane.f32.xlu0 %v2319_v2 }
 0x21a   : > { %v909_v26 = vpop.f32.mrb[31].mxu1  ;;  %1035 = vadd.xlane.f32.xlu1 %v2322_v20  ;;  %v918_v31 = vadd.f32 %v1716_v8, %v2183_v51  ;;  %v2339_v28 = vadd.f32 %v951_v30, %v915_v11 }
 0x21b   : > { %v910_v23 = vadd.f32 %v2183_v51, %v909_v26  ;;  %v2330_v13 = vadd.f32 %v949_v5, %v907_v6 }
 0x21c   : > { %v2342_v38 = vadd.f32 %v952_v37, %v918_v31 }
 0x21d   : > { %1041 = vadd.xlane.f32.xlu0 %v2330_v13  ;;  %v2335_v34 = vadd.f32 %v950_v9, %v910_v23 }
 0x21f   : > { %1043 = vadd.xlane.f32.xlu1 %v2335_v34 }
 0x221   : > { %1045 = vadd.xlane.f32.xlu0 %v2339_v28 }
 0x223   : > { %1047 = vadd.xlane.f32.xlu1 %v2342_v38 }
 0x271   : > { %v990_v22 = vpop.xlane.xlu1 %989 }
 0x272   : > { %v1052_v15 = vmul.f32 0.0078125, %v990_v22  ;;  %v986_v41 = vpop.xlane.xlu0 %985 }
 0x273   : > { %v1050_v51 = vmul.f32 0.0078125, %v986_v41 }
 0x274   : > { %v2346_v42 = vsub.f32 %v2191_v61, %v1052_v15 }
 0x275   : > { %v992_v43 = vpop.xlane.xlu1 %991  ;;  %v2349_v29 = vsub.f32 %v2195_v0, %v1050_v51 }
 0x276   : > { %v1053_v25 = vmul.f32 0.0078125, %v992_v43  ;;  %v988_v45 = vpop.xlane.xlu0 %987  ;;  %v1116_v46 = vmul.f32 %v2346_v42, %v2346_v42 }
 0x277   : > { %v1051_v49 = vmul.f32 0.0078125, %v988_v45  ;;  %v1114_v0 = vmul.f32 %v2349_v29, %v2349_v29 }
 0x278   : > { %v2354_v52 = vsub.f32 %v2201_v4, %v1053_v25  ;;  %1150 = vadd.xlane.f32.xlu0 %v1116_v46 }
 0x279   : > { %v2357_v18 = vsub.f32 %v2199_v1, %v1051_v49 }
 0x27a   : > { %v998_v54 = vpop.xlane.xlu0 %997  ;;  %v1117_v61 = vmul.f32 %v2354_v52, %v2354_v52 }
 0x27b   : > { %v1056_v24 = vmul.f32 0.0078125, %v998_v54  ;;  %v1000_v32 = vpop.xlane.xlu1 %999  ;;  %v1115_v59 = vmul.f32 %v2357_v18, %v2357_v18 }
 0x27c   : > { %v1057_v57 = vmul.f32 0.0078125, %v1000_v32  ;;  %1152 = vadd.xlane.f32.xlu1 %v1117_v61  ;;  %1146 = vadd.xlane.f32.xlu0 %v1114_v0 }
 0x27d   : > { %v2364_v21 = vsub.f32 %v2209_v10, %v1056_v24 }
 0x27e   : > { %v2367_v4 = vsub.f32 %v2214_v16, %v1057_v57  ;;  %v994_v1 = vpop.xlane.xlu0 %993 }
 0x27f   : > { %v1054_v27 = vmul.f32 0.0078125, %v994_v1  ;;  %v996_v63 = vpop.xlane.xlu1 %995  ;;  %v1120_v5 = vmul.f32 %v2364_v21, %v2364_v21 }
 0x280   : > { %v1055_v14 = vmul.f32 0.0078125, %v996_v63  ;;  %1148 = vadd.xlane.f32.xlu1 %v1115_v59  ;;  %v1121_v8 = vmul.f32 %v2367_v4, %v2367_v4 }
 0x281   : > { %v2374_v6 = vsub.f32 %v2220_v33, %v1054_v27  ;;  %1158 = vadd.xlane.f32.xlu0 %v1120_v5 }
 0x282   : > { %v2377_v10 = vsub.f32 %v2223_v36, %v1055_v14  ;;  %v1006_v16 = vpop.xlane.xlu0 %1005 }
 0x283   : > { %v1060_v9 = vmul.f32 0.0078125, %v1006_v16  ;;  %v1008_v26 = vpop.xlane.xlu1 %1007  ;;  %v1118_v11 = vmul.f32 %v2374_v6, %v2374_v6 }
 0x284   : > { %v1061_v23 = vmul.f32 0.0078125, %v1008_v26  ;;  %1160 = vadd.xlane.f32.xlu1 %v1121_v8  ;;  %v1119_v31 = vmul.f32 %v2377_v10, %v2377_v10 }
 0x285   : > { %v2384_v30 = vsub.f32 %v2229_v40, %v1060_v9  ;;  %1154 = vadd.xlane.f32.xlu0 %v1118_v11 }
 0x286   : > { %v2387_v33 = vsub.f32 %v2234_v44, %v1061_v23  ;;  %v1002_v36 = vpop.xlane.xlu0 %1001 }
 0x287   : > { %v1058_v37 = vmul.f32 0.0078125, %v1002_v36  ;;  %v1004_v22 = vpop.xlane.xlu1 %1003  ;;  %v1124_v15 = vmul.f32 %v2384_v30, %v2384_v30 }
 0x288   : > { %v1059_v41 = vmul.f32 0.0078125, %v1004_v22  ;;  %1156 = vadd.xlane.f32.xlu1 %v1119_v31  ;;  %v1125_v43 = vmul.f32 %v2387_v33, %v2387_v33 }
 0x289   : > { %v2394_v51 = vsub.f32 %v2240_v47, %v1058_v37  ;;  %1166 = vadd.xlane.f32.xlu0 %v1124_v15 }
 0x28a   : > { %v2397_v40 = vsub.f32 %v2243_v50, %v1059_v41  ;;  %v1014_v44 = vpop.xlane.xlu0 %1013 }
 0x28b   : > { %v1064_v25 = vmul.f32 0.0078125, %v1014_v44  ;;  %v1016_v45 = vpop.xlane.xlu1 %1015  ;;  %v1122_v46 = vmul.f32 %v2394_v51, %v2394_v51 }
 0x28c   : > { %v1065_v49 = vmul.f32 0.0078125, %v1016_v45  ;;  %1168 = vadd.xlane.f32.xlu1 %v1125_v43  ;;  %v1123_v61 = vmul.f32 %v2397_v40, %v2397_v40 }
 0x28d   : > { %v2404_v54 = vsub.f32 %v2249_v55, %v1064_v25  ;;  %1162 = vadd.xlane.f32.xlu0 %v1122_v46 }
 0x28e   : > { %v2407_v47 = vsub.f32 %v2254_v58, %v1065_v49  ;;  %v1010_v50 = vpop.xlane.xlu0 %1009 }
 0x28f   : > { %v1062_v0 = vmul.f32 0.0078125, %v1010_v50  ;;  %v1012_v24 = vpop.xlane.xlu1 %1011  ;;  %v1128_v32 = vmul.f32 %v2404_v54, %v2404_v54 }
 0x290   : > { %v1063_v57 = vmul.f32 0.0078125, %v1012_v24  ;;  %1164 = vadd.xlane.f32.xlu1 %v1123_v61  ;;  %v1129_v59 = vmul.f32 %v2407_v47, %v2407_v47 }
 0x291   : > { %v2414_v1 = vsub.f32 %v2260_v62, %v1062_v0  ;;  %1174 = vadd.xlane.f32.xlu0 %v1128_v32 }
 0x292   : > { %v2417_v55 = vsub.f32 %v2263_v3, %v1063_v57  ;;  %v1022_v58 = vpop.xlane.xlu0 %1021 }
 0x293   : > { %v1068_v27 = vmul.f32 0.0078125, %v1022_v58  ;;  %v1024_v63 = vpop.xlane.xlu1 %1023  ;;  %v1126_v5 = vmul.f32 %v2414_v1, %v2414_v1 }
 0x294   : > { %v1069_v14 = vmul.f32 0.0078125, %v1024_v63  ;;  %1176 = vadd.xlane.f32.xlu1 %v1129_v59  ;;  %v1127_v8 = vmul.f32 %v2417_v55, %v2417_v55 }
 0x295   : > { %v2424_v16 = vsub.f32 %v2269_v7, %v1068_v27  ;;  %1170 = vadd.xlane.f32.xlu0 %v1126_v5 }
 0x296   : > { %v2427_v62 = vsub.f32 %v2274_v12, %v1069_v14  ;;  %v1018_v3 = vpop.xlane.xlu0 %1017 }
 0x297   : > { %v1066_v9 = vmul.f32 0.0078125, %v1018_v3  ;;  %v1020_v26 = vpop.xlane.xlu1 %1019  ;;  %v1132_v11 = vmul.f32 %v2424_v16, %v2424_v16 }
 0x298   : > { %v1067_v23 = vmul.f32 0.0078125, %v1020_v26  ;;  %1172 = vadd.xlane.f32.xlu1 %v1127_v8  ;;  %v1133_v31 = vmul.f32 %v2427_v62, %v2427_v62 }
 0x299   : > { %v2434_v36 = vsub.f32 %v2280_v17, %v1066_v9  ;;  %1182 = vadd.xlane.f32.xlu0 %v1132_v11 }
 0x29a   : > { %v2437_v7 = vsub.f32 %v2283_v35, %v1067_v23  ;;  %v1030_v12 = vpop.xlane.xlu0 %1029 }
 0x29b   : > { %v1072_v37 = vmul.f32 0.0078125, %v1030_v12  ;;  %v1032_v22 = vpop.xlane.xlu1 %1031  ;;  %v1130_v15 = vmul.f32 %v2434_v36, %v2434_v36 }
 0x29c   : > { %v1073_v41 = vmul.f32 0.0078125, %v1032_v22  ;;  %1184 = vadd.xlane.f32.xlu1 %v1133_v31  ;;  %v1131_v43 = vmul.f32 %v2437_v7, %v2437_v7 }
 0x29d   : > { %v2444_v44 = vsub.f32 %v2289_v39, %v1072_v37  ;;  %1178 = vadd.xlane.f32.xlu0 %v1130_v15 }
 0x29e   : > { %v2447_v17 = vsub.f32 %v2294_v19, %v1073_v41  ;;  %v1026_v35 = vpop.xlane.xlu0 %1025 }
 0x29f   : > { %v1070_v25 = vmul.f32 0.0078125, %v1026_v35  ;;  %v1028_v45 = vpop.xlane.xlu1 %1027  ;;  %v1136_v46 = vmul.f32 %v2444_v44, %v2444_v44 }
 0x2a0   : > { %v1071_v49 = vmul.f32 0.0078125, %v1028_v45  ;;  %1180 = vadd.xlane.f32.xlu1 %v1131_v43  ;;  %v1137_v61 = vmul.f32 %v2447_v17, %v2447_v17 }
 0x2a1   : > { %v2454_v50 = vsub.f32 %v2300_v48, %v1070_v25  ;;  %1190 = vadd.xlane.f32.xlu0 %v1136_v46 }
 0x2a2   : > { %v2457_v39 = vsub.f32 %v2303_v53, %v1071_v49  ;;  %v1038_v19 = vpop.xlane.xlu0 %1037 }
 0x2a3   : > { %v1076_v0 = vmul.f32 0.0078125, %v1038_v19  ;;  %v1040_v24 = vpop.xlane.xlu1 %1039  ;;  %v1134_v32 = vmul.f32 %v2454_v50, %v2454_v50 }
 0x2a4   : > { %v1077_v57 = vmul.f32 0.0078125, %v1040_v24  ;;  %1192 = vadd.xlane.f32.xlu1 %v1137_v61  ;;  %v1135_v59 = vmul.f32 %v2457_v39, %v2457_v39 }
 0x2a5   : > { %v2464_v58 = vsub.f32 %v2309_v56, %v1076_v0  ;;  %1186 = vadd.xlane.f32.xlu0 %v1134_v32 }
 0x2a6   : > { %v2467_v48 = vsub.f32 %v2314_v60, %v1077_v57  ;;  %v1034_v53 = vpop.xlane.xlu0 %1033 }
 0x2a7   : > { %v1074_v27 = vmul.f32 0.0078125, %v1034_v53  ;;  %v1036_v63 = vpop.xlane.xlu1 %1035  ;;  %v1140_v5 = vmul.f32 %v2464_v58, %v2464_v58 }
 0x2a8   : > { %v1075_v14 = vmul.f32 0.0078125, %v1036_v63  ;;  %1188 = vadd.xlane.f32.xlu1 %v1135_v59  ;;  %v1141_v8 = vmul.f32 %v2467_v48, %v2467_v48 }
 0x2a9   : > { %v2474_v3 = vsub.f32 %v2319_v2, %v1074_v27  ;;  %1198 = vadd.xlane.f32.xlu0 %v1140_v5 }
 0x2aa   : > { %v2477_v56 = vsub.f32 %v2322_v20, %v1075_v14  ;;  %v1042_v60 = vpop.xlane.xlu0 %1041 }
 0x2ab   : > { %v1078_v9 = vmul.f32 0.0078125, %v1042_v60  ;;  %v1138_v26 = vmul.f32 %v2474_v3, %v2474_v3 }
 0x2ac   : > { %v1044_v11 = vpop.xlane.xlu1 %1043  ;;  %1200 = vadd.xlane.f32.xlu1 %v1141_v8  ;;  %v1139_v20 = vmul.f32 %v2477_v56, %v2477_v56 }
 0x2ad   : > { %v2484_v23 = vsub.f32 %v2330_v13, %v1078_v9  ;;  %v1079_v12 = vmul.f32 0.0078125, %v1044_v11  ;;  %1194 = vadd.xlane.f32.xlu0 %v1138_v26  ;;  %v2509_v26 = vld [vmem:[%s2705_s5] ss:$0 sm:$0xff] }
 0x2ae   : > { %v1046_v2 = vpop.xlane.xlu0 %1045 }
 0x2af   : > { %v2489_v31 = vsub.f32 %v2335_v34, %v1079_v12  ;;  %v1080_v37 = vmul.f32 0.0078125, %v1046_v2  ;;  %v1142_v22 = vmul.f32 %v2484_v23, %v2484_v23 }
 0x2b0   : > { %v1048_v15 = vpop.xlane.xlu1 %1047  ;;  %1196 = vadd.xlane.f32.xlu1 %v1139_v20 }
 0x2b1   : > { %v2494_v41 = vsub.f32 %v2339_v28, %v1080_v37  ;;  %v1081_v13 = vmul.f32 0.0078125, %v1048_v15  ;;  %1202 = vadd.xlane.f32.xlu0 %v1142_v22  ;;  %v1143_v35 = vmul.f32 %v2489_v31, %v2489_v31  ;;  %v2517_v37 = vld [vmem:[%s2706_s6] ss:$0 sm:$0xff] }
 0x2b3   : > { %v2499_v43 = vsub.f32 %v2342_v38, %v1081_v13  ;;  %v1144_v34 = vmul.f32 %v2494_v41, %v2494_v41 }
 0x2b4   : > { %1204 = vadd.xlane.f32.xlu1 %v1143_v35 }
 0x2b5   : > { %1206 = vadd.xlane.f32.xlu0 %v1144_v34  ;;  %v1145_v25 = vmul.f32 %v2499_v43, %v2499_v43 }
 0x2b8   : > { %1208 = vadd.xlane.f32.xlu1 %v1145_v25 }
 0x305   : > { %v1151_v45 = vpop.xlane.xlu0 %1150 }
 0x306   : > { %v1212_v28 = vmul.f32 0.0078125, %v1151_v45 }
 0x308   : > { %v1244_v46 = vadd.f32 1e-05, %v1212_v28 }
 0x309   : > { %v1153_v49 = vpop.xlane.xlu1 %1152  ;;  %v1147_v19 = vpop.xlane.xlu0 %1146 }
 0x30a   : > { %1806 = vrsqrt.f32 %v1244_v46  ;;  %v1213_v61 = vmul.f32 0.0078125, %v1153_v49  ;;  %v1210_v0 = vmul.f32 0.0078125, %v1147_v19 }
 0x30c   : > { %v1245_v38 = vadd.f32 1e-05, %v1213_v61  ;;  %v1242_v24 = vadd.f32 1e-05, %v1210_v0 }
 0x30d   : > { %v1149_v32 = vpop.xlane.xlu1 %1148 }
 0x30e   : > { %1808 = vrsqrt.f32 %v1245_v38  ;;  %v1211_v57 = vmul.f32 0.0078125, %v1149_v32  ;;  %v1159_v53 = vpop.xlane.xlu0 %1158 }
 0x30f   : > { %1810 = vrsqrt.f32 %v1242_v24  ;;  %v1216_v59 = vmul.f32 0.0078125, %v1159_v53 }
 0x310   : > { %v1243_v27 = vadd.f32 1e-05, %v1211_v57 }
 0x311   : > { %v1248_v63 = vadd.f32 1e-05, %v1216_v59  ;;  %v1161_v5 = vpop.xlane.xlu1 %1160 }
 0x312   : > { %1812 = vrsqrt.f32 %v1243_v27  ;;  %v1217_v14 = vmul.f32 0.0078125, %v1161_v5  ;;  %v1155_v60 = vpop.xlane.xlu0 %1154 }
 0x313   : > { %1814 = vrsqrt.f32 %v1248_v63  ;;  %v1214_v8 = vmul.f32 0.0078125, %v1155_v60 }
 0x314   : > { %v1807_v9 = vpop.eup %1806  ;;  %v1249_v11 = vadd.f32 1e-05, %v1217_v14 }
 0x315   : > { %v1308_v12 = vmul.f32 %v1807_v9, %v2346_v42  ;;  %v1246_v2 = vadd.f32 1e-05, %v1214_v8  ;;  %v1157_v20 = vpop.xlane.xlu1 %1156 }
 0x316   : > { %1816 = vrsqrt.f32 %v1249_v11  ;;  %v1215_v22 = vmul.f32 0.0078125, %v1157_v20  ;;  %v1167_v15 = vpop.xlane.xlu0 %1166 }
 0x317   : > { %v1347_v13 = vmul.f32 %v2509_v26, %v1308_v12  ;;  %1818 = vrsqrt.f32 %v1246_v2  ;;  %v1220_v35 = vmul.f32 0.0078125, %v1167_v15 }
 0x318   : > { %v1809_v34 = vpop.eup %1808  ;;  %v1247_v25 = vadd.f32 1e-05, %v1215_v22 }
 0x319   : > { %v1811_v45 = vpop.eup %1810  ;;  %v1386_v28 = vadd.f32 %v2517_v37, %v1347_v13  ;;  %v1309_v42 = vmul.f32 %v1809_v34, %v2354_v52  ;;  %v1252_v46 = vadd.f32 1e-05, %v1220_v35  ;;  %v1169_v49 = vpop.xlane.xlu1 %1168 }
 0x31a   : > { %v1306_v19 = vmul.f32 %v1811_v45, %v2349_v29  ;;  %1820 = vrsqrt.f32 %v1247_v25  ;;  %v1221_v61 = vmul.f32 0.0078125, %v1169_v49  ;;  %v1163_v0 = vpop.xlane.xlu0 %1162 }
 0x31b   : > { %1418 = vst [vmem:[%s2523_s19 + $0x10] sm:$0xff] %v1386_v28  ;;  %v1348_v38 = vmul.f32 %v2509_v26, %v1309_v42  ;;  %1822 = vrsqrt.f32 %v1252_v46  ;;  %v1218_v24 = vmul.f32 0.0078125, %v1163_v0 }
 0x31c   : > { %v1813_v32 = vpop.eup %1812  ;;  %v1345_v57 = vmul.f32 %v2509_v26, %v1306_v19  ;;  %v1253_v52 = vadd.f32 1e-05, %v1221_v61 }
 0x31d   : > { %v1815_v53 = vpop.eup %1814  ;;  %v1387_v29 = vadd.f32 %v2517_v37, %v1348_v38  ;;  %v1307_v59 = vmul.f32 %v1813_v32, %v2357_v18  ;;  %v1250_v27 = vadd.f32 1e-05, %v1218_v24  ;;  %v1165_v63 = vpop.xlane.xlu1 %1164 }
 0x31e   : > { %v1384_v5 = vadd.f32 %v2517_v37, %v1345_v57  ;;  %v1312_v14 = vmul.f32 %v1815_v53, %v2364_v21  ;;  %1824 = vrsqrt.f32 %v1253_v52  ;;  %v1219_v60 = vmul.f32 0.0078125, %v1165_v63  ;;  %v1175_v8 = vpop.xlane.xlu0 %1174 }
 0x31f   : > { %1419 = vst [vmem:[%s2523_s19 + $0x18] sm:$0xff] %v1387_v29  ;;  %v1346_v9 = vmul.f32 %v2509_v26, %v1307_v59  ;;  %1826 = vrsqrt.f32 %v1250_v27  ;;  %v1224_v11 = vmul.f32 0.0078125, %v1175_v8 }
 0x320   : > { %v1817_v12 = vpop.eup %1816  ;;  %1416 = vst [vmem:[%s2523_s19] sm:$0xff] %v1384_v5  ;;  %v1351_v2 = vmul.f32 %v2509_v26, %v1312_v14  ;;  %v1251_v18 = vadd.f32 1e-05, %v1219_v60 }
 0x321   : > { %v1819_v20 = vpop.eup %1818  ;;  %v1385_v22 = vadd.f32 %v2517_v37, %v1346_v9  ;;  %v1313_v21 = vmul.f32 %v1817_v12, %v2367_v4  ;;  %v1256_v15 = vadd.f32 1e-05, %v1224_v11  ;;  %v1177_v13 = vpop.xlane.xlu1 %1176 }
 0x322   : > { %v1390_v35 = vadd.f32 %v2517_v37, %v1351_v2  ;;  %v1310_v34 = vmul.f32 %v1819_v20, %v2374_v6  ;;  %1828 = vrsqrt.f32 %v1251_v18  ;;  %v1225_v25 = vmul.f32 0.0078125, %v1177_v13  ;;  %v1171_v45 = vpop.xlane.xlu0 %1170 }
 0x323   : > { %1417 = vst [vmem:[%s2523_s19 + $0x8] sm:$0xff] %v1385_v22  ;;  %v1352_v28 = vmul.f32 %v2509_v26, %v1313_v21  ;;  %1830 = vrsqrt.f32 %v1256_v15  ;;  %v1222_v42 = vmul.f32 0.0078125, %v1171_v45 }
 0x324   : > { %v1821_v46 = vpop.eup %1820  ;;  %1422 = vst [vmem:[%s2523_s19 + $0x30] sm:$0xff] %v1390_v35  ;;  %v1349_v49 = vmul.f32 %v2509_v26, %v1310_v34  ;;  %v1257_v4 = vadd.f32 1e-05, %v1225_v25 }
 0x325   : > { %v1823_v19 = vpop.eup %1822  ;;  %v1391_v61 = vadd.f32 %v2517_v37, %v1352_v28  ;;  %v1311_v6 = vmul.f32 %v1821_v46, %v2377_v10  ;;  %v1254_v0 = vadd.f32 1e-05, %v1222_v42  ;;  %v1173_v38 = vpop.xlane.xlu1 %1172 }
 0x326   : > { %v1388_v24 = vadd.f32 %v2517_v37, %v1349_v49  ;;  %v1316_v32 = vmul.f32 %v1823_v19, %v2384_v30  ;;  %1832 = vrsqrt.f32 %v1257_v4  ;;  %v1223_v57 = vmul.f32 0.0078125, %v1173_v38  ;;  %v1183_v52 = vpop.xlane.xlu0 %1182 }
 0x327   : > { %1423 = vst [vmem:[%s2523_s19 + $0x38] sm:$0xff] %v1391_v61  ;;  %v1350_v53 = vmul.f32 %v2509_v26, %v1311_v6  ;;  %1834 = vrsqrt.f32 %v1254_v0  ;;  %v1228_v29 = vmul.f32 0.0078125, %v1183_v52 }
 0x328   : > { %v1825_v59 = vpop.eup %1824  ;;  %1420 = vst [vmem:[%s2523_s19 + $0x20] sm:$0xff] %v1388_v24  ;;  %v1355_v27 = vmul.f32 %v2509_v26, %v1316_v32  ;;  %v1255_v10 = vadd.f32 1e-05, %v1223_v57 }
 0x329   : > { %v1827_v63 = vpop.eup %1826  ;;  %v1389_v5 = vadd.f32 %v2517_v37, %v1350_v53  ;;  %v1317_v30 = vmul.f32 %v1825_v59, %v2387_v33  ;;  %v1260_v14 = vadd.f32 1e-05, %v1228_v29  ;;  %v1185_v60 = vpop.xlane.xlu1 %1184 }
 0x32a   : > { %v1394_v8 = vadd.f32 %v2517_v37, %v1355_v27  ;;  %v1314_v9 = vmul.f32 %v1827_v63, %v2394_v51  ;;  %1836 = vrsqrt.f32 %v1255_v10  ;;  %v1229_v11 = vmul.f32 0.0078125, %v1185_v60  ;;  %v1179_v12 = vpop.xlane.xlu0 %1178 }
 0x32b   : > { %1421 = vst [vmem:[%s2523_s19 + $0x28] sm:$0xff] %v1389_v5  ;;  %v1356_v2 = vmul.f32 %v2509_v26, %v1317_v30  ;;  %1838 = vrsqrt.f32 %v1260_v14  ;;  %v1226_v18 = vmul.f32 0.0078125, %v1179_v12 }
 0x32c   : > { %v1829_v20 = vpop.eup %1828  ;;  %1426 = vst [vmem:[%s2523_s19 + $0x50] sm:$0xff] %v1394_v8  ;;  %v1353_v22 = vmul.f32 %v2509_v26, %v1314_v9  ;;  %v1261_v33 = vadd.f32 1e-05, %v1229_v11 }
 0x32d   : > { %v1831_v21 = vpop.eup %1830  ;;  %v1395_v15 = vadd.f32 %v2517_v37, %v1356_v2  ;;  %v1315_v51 = vmul.f32 %v1829_v20, %v2397_v40  ;;  %v1258_v13 = vadd.f32 1e-05, %v1226_v18  ;;  %v1181_v35 = vpop.xlane.xlu1 %1180 }
 0x32e   : > { %v1392_v34 = vadd.f32 %v2517_v37, %v1353_v22  ;;  %v1320_v25 = vmul.f32 %v1831_v21, %v2404_v54  ;;  %1840 = vrsqrt.f32 %v1261_v33  ;;  %v1227_v45 = vmul.f32 0.0078125, %v1181_v35  ;;  %v1191_v28 = vpop.xlane.xlu0 %1190 }
 0x32f   : > { %1427 = vst [vmem:[%s2523_s19 + $0x58] sm:$0xff] %v1395_v15  ;;  %v1354_v42 = vmul.f32 %v2509_v26, %v1315_v51  ;;  %1842 = vrsqrt.f32 %v1258_v13  ;;  %v1232_v46 = vmul.f32 0.0078125, %v1191_v28 }
 0x330   : > { %v1833_v49 = vpop.eup %1832  ;;  %1424 = vst [vmem:[%s2523_s19 + $0x40] sm:$0xff] %v1392_v34  ;;  %v1359_v4 = vmul.f32 %v2509_v26, %v1320_v25  ;;  %v1259_v40 = vadd.f32 1e-05, %v1227_v45 }
 0x331   : > { %v1835_v19 = vpop.eup %1834  ;;  %v1393_v61 = vadd.f32 %v2517_v37, %v1354_v42  ;;  %v1321_v54 = vmul.f32 %v1833_v49, %v2407_v47  ;;  %v1264_v6 = vadd.f32 1e-05, %v1232_v46  ;;  %v1193_v0 = vpop.xlane.xlu1 %1192 }
 0x332   : > { %v1398_v38 = vadd.f32 %v2517_v37, %v1359_v4  ;;  %v1318_v24 = vmul.f32 %v1835_v19, %v2414_v1  ;;  %1844 = vrsqrt.f32 %v1259_v40  ;;  %v1233_v32 = vmul.f32 0.0078125, %v1193_v0  ;;  %v1187_v57 = vpop.xlane.xlu0 %1186 }
 0x333   : > { %1425 = vst [vmem:[%s2523_s19 + $0x48] sm:$0xff] %v1393_v61  ;;  %v1360_v52 = vmul.f32 %v2509_v26, %v1321_v54  ;;  %1846 = vrsqrt.f32 %v1264_v6  ;;  %v1230_v53 = vmul.f32 0.0078125, %v1187_v57 }
 0x334   : > { %v1837_v29 = vpop.eup %1836  ;;  %1430 = vst [vmem:[%s2523_s19 + $0x70] sm:$0xff] %v1398_v38  ;;  %v1357_v59 = vmul.f32 %v2509_v26, %v1318_v24  ;;  %v1265_v47 = vadd.f32 1e-05, %v1233_v32 }
 0x335   : > { %v1839_v27 = vpop.eup %1838  ;;  %v1399_v10 = vadd.f32 %v2517_v37, %v1360_v52  ;;  %v1319_v1 = vmul.f32 %v1837_v29, %v2417_v55  ;;  %v1262_v63 = vadd.f32 1e-05, %v1230_v53  ;;  %v1189_v5 = vpop.xlane.xlu1 %1188 }
 0x336   : > { %v1396_v30 = vadd.f32 %v2517_v37, %v1357_v59  ;;  %v1324_v14 = vmul.f32 %v1839_v27, %v2424_v16  ;;  %1848 = vrsqrt.f32 %v1265_v47  ;;  %v1231_v60 = vmul.f32 0.0078125, %v1189_v5  ;;  %v1199_v8 = vpop.xlane.xlu0 %1198 }
 0x337   : > { %1431 = vst [vmem:[%s2523_s19 + $0x78] sm:$0xff] %v1399_v10  ;;  %v1358_v9 = vmul.f32 %v2509_v26, %v1319_v1  ;;  %1850 = vrsqrt.f32 %v1262_v63  ;;  %v1236_v11 = vmul.f32 0.0078125, %v1199_v8 }
 0x338   : > { %v1841_v12 = vpop.eup %1840  ;;  %1428 = vst [vmem:[%s2523_s19 + $0x60] sm:$0xff] %v1396_v30  ;;  %v1363_v2 = vmul.f32 %v2509_v26, %v1324_v14  ;;  %v1263_v55 = vadd.f32 1e-05, %v1231_v60 }
 0x339   : > { %v1843_v18 = vpop.eup %1842  ;;  %v1397_v20 = vadd.f32 %v2517_v37, %v1358_v9  ;;  %v1325_v16 = vmul.f32 %v1841_v12, %v2427_v62  ;;  %v1268_v22 = vadd.f32 1e-05, %v1236_v11  ;;  %v1201_v33 = vpop.xlane.xlu1 %1200 }
 0x33a   : > { %v1402_v21 = vadd.f32 %v2517_v37, %v1363_v2  ;;  %v1322_v15 = vmul.f32 %v1843_v18, %v2434_v36  ;;  %1852 = vrsqrt.f32 %v1263_v55  ;;  %v1237_v51 = vmul.f32 0.0078125, %v1201_v33  ;;  %v1195_v13 = vpop.xlane.xlu0 %1194 }
 0x33b   : > { %1429 = vst [vmem:[%s2523_s19 + $0x68] sm:$0xff] %v1397_v20  ;;  %v1364_v35 = vmul.f32 %v2509_v26, %v1325_v16  ;;  %1854 = vrsqrt.f32 %v1268_v22  ;;  %v1234_v34 = vmul.f32 0.0078125, %v1195_v13 }
 0x33c   : > { %v1845_v25 = vpop.eup %1844  ;;  %1434 = vst [vmem:[%s2523_s19 + $0x90] sm:$0xff] %v1402_v21  ;;  %v1361_v45 = vmul.f32 %v2509_v26, %v1322_v15  ;;  %v1269_v62 = vadd.f32 1e-05, %v1237_v51 }
 0x33d   : > { %v1847_v28 = vpop.eup %1846  ;;  %v1403_v42 = vadd.f32 %v2517_v37, %v1364_v35  ;;  %v1323_v36 = vmul.f32 %v1845_v25, %v2437_v7  ;;  %v1266_v46 = vadd.f32 1e-05, %v1234_v34  ;;  %v1197_v49 = vpop.xlane.xlu1 %1196 }
 0x33e   : > { %v1400_v4 = vadd.f32 %v2517_v37, %v1361_v45  ;;  %v1328_v40 = vmul.f32 %v1847_v28, %v2444_v44  ;;  %1856 = vrsqrt.f32 %v1269_v62  ;;  %v1235_v19 = vmul.f32 0.0078125, %v1197_v49  ;;  %v1203_v61 = vpop.xlane.xlu0 %1202 }
 0x33f   : > { %1435 = vst [vmem:[%s2523_s19 + $0x98] sm:$0xff] %v1403_v42  ;;  %v1362_v54 = vmul.f32 %v2509_v26, %v1323_v36  ;;  %1858 = vrsqrt.f32 %v1266_v46  ;;  %v1238_v6 = vmul.f32 0.0078125, %v1203_v61 }
 0x340   : > { %v1849_v0 = vpop.eup %1848  ;;  %1432 = vst [vmem:[%s2523_s19 + $0x80] sm:$0xff] %v1400_v4  ;;  %v1367_v38 = vmul.f32 %v2509_v26, %v1328_v40  ;;  %v1267_v7 = vadd.f32 1e-05, %v1235_v19 }
 0x341   : > { %v1851_v24 = vpop.eup %1850  ;;  %v1401_v32 = vadd.f32 %v2517_v37, %v1362_v54  ;;  %v1329_v44 = vmul.f32 %v1849_v0, %v2447_v17  ;;  %v1270_v57 = vadd.f32 1e-05, %v1238_v6  ;;  %v1205_v52 = vpop.xlane.xlu1 %1204 }
 0x342   : > { %v1406_v53 = vadd.f32 %v2517_v37, %v1367_v38  ;;  %v1326_v29 = vmul.f32 %v1851_v24, %v2454_v50  ;;  %1860 = vrsqrt.f32 %v1267_v7  ;;  %v1239_v59 = vmul.f32 0.0078125, %v1205_v52  ;;  %v1207_v47 = vpop.xlane.xlu0 %1206 }
 0x343   : > { %1433 = vst [vmem:[%s2523_s19 + $0x88] sm:$0xff] %v1401_v32  ;;  %v1368_v27 = vmul.f32 %v2509_v26, %v1329_v44  ;;  %1862 = vrsqrt.f32 %v1270_v57  ;;  %v1240_v10 = vmul.f32 0.0078125, %v1207_v47 }
 0x344   : > { %v1853_v1 = vpop.eup %1852  ;;  %1438 = vst [vmem:[%s2523_s19 + $0xb0] sm:$0xff] %v1406_v53  ;;  %v1365_v17 = vmul.f32 %v2509_v26, %v1326_v29  ;;  %v1271_v63 = vadd.f32 1e-05, %v1239_v59 }
 0x345   : > { %v1855_v5 = vpop.eup %1854  ;;  %v1407_v30 = vadd.f32 %v2517_v37, %v1368_v27  ;;  %v1327_v50 = vmul.f32 %v1853_v1, %v2457_v39  ;;  %v1272_v14 = vadd.f32 1e-05, %v1240_v10  ;;  %v1209_v60 = vpop.xlane.xlu1 %1208 }
 0x346   : > { %v1404_v8 = vadd.f32 %v2517_v37, %v1365_v17  ;;  %v1332_v9 = vmul.f32 %v1855_v5, %v2464_v58  ;;  %1864 = vrsqrt.f32 %v1271_v63  ;;  %v1241_v11 = vmul.f32 0.0078125, %v1209_v60 }
 0x347   : > { %1439 = vst [vmem:[%s2523_s19 + $0xb8] sm:$0xff] %v1407_v30  ;;  %v1366_v12 = vmul.f32 %v2509_v26, %v1327_v50  ;;  %1866 = vrsqrt.f32 %v1272_v14 }
 0x348   : > { %v1857_v2 = vpop.eup %1856  ;;  %1436 = vst [vmem:[%s2523_s19 + $0xa0] sm:$0xff] %v1404_v8  ;;  %v1371_v55 = vmul.f32 %v2509_v26, %v1332_v9  ;;  %v1273_v18 = vadd.f32 1e-05, %v1241_v11 }
 0x349   : > { %v1859_v39 = vpop.eup %1858  ;;  %v1405_v20 = vadd.f32 %v2517_v37, %v1366_v12  ;;  %v1333_v16 = vmul.f32 %v1857_v2, %v2467_v48 }
 0x34a   : > { %v1410_v58 = vadd.f32 %v2517_v37, %v1371_v55  ;;  %v1330_v22 = vmul.f32 %v1859_v39, %v2474_v3  ;;  %1868 = vrsqrt.f32 %v1273_v18 }
 0x34b   : > { %1437 = vst [vmem:[%s2523_s19 + $0xa8] sm:$0xff] %v1405_v20  ;;  %v1372_v33 = vmul.f32 %v2509_v26, %v1333_v16 }
 0x34c   : > { %v1861_v21 = vpop.eup %1860  ;;  %1442 = vst [vmem:[%s2523_s19 + $0xd0] sm:$0xff] %v1410_v58  ;;  %v1369_v15 = vmul.f32 %v2509_v26, %v1330_v22 }
 0x34d   : > { %v1863_v51 = vpop.eup %1862  ;;  %v1411_v13 = vadd.f32 %v2517_v37, %v1372_v33  ;;  %v1331_v35 = vmul.f32 %v1861_v21, %v2477_v56 }
 0x34e   : > { %v1408_v48 = vadd.f32 %v2517_v37, %v1369_v15  ;;  %v1334_v34 = vmul.f32 %v1863_v51, %v2484_v23 }
 0x34f   : > { %1443 = vst [vmem:[%s2523_s19 + $0xd8] sm:$0xff] %v1411_v13  ;;  %v1370_v3 = vmul.f32 %v2509_v26, %v1331_v35 }
 0x350   : > { %v1865_v25 = vpop.eup %1864  ;;  %1440 = vst [vmem:[%s2523_s19 + $0xc0] sm:$0xff] %v1408_v48  ;;  %v1373_v45 = vmul.f32 %v2509_v26, %v1334_v34 }
 0x351   : > { %v1867_v62 = vpop.eup %1866  ;;  %v1409_v28 = vadd.f32 %v2517_v37, %v1370_v3  ;;  %v1335_v56 = vmul.f32 %v1865_v25, %v2489_v31 }
 0x352   : > { %v1412_v42 = vadd.f32 %v2517_v37, %v1373_v45  ;;  %v1336_v23 = vmul.f32 %v1867_v62, %v2494_v41 }
 0x353   : > { %1441 = vst [vmem:[%s2523_s19 + $0xc8] sm:$0xff] %v1409_v28  ;;  %v1374_v36 = vmul.f32 %v2509_v26, %v1335_v56 }
 0x354   : > { %v1869_v46 = vpop.eup %1868  ;;  %1444 = vst [vmem:[%s2523_s19 + $0xe0] sm:$0xff] %v1412_v42  ;;  %v1375_v49 = vmul.f32 %v2509_v26, %v1336_v23 }
 0x355   : > { %v1413_v4 = vadd.f32 %v2517_v37, %v1374_v36  ;;  %v1337_v40 = vmul.f32 %v1869_v46, %v2499_v43 }
 0x356   : > { %v1414_v31 = vadd.f32 %v2517_v37, %v1375_v49 }
 0x357   : > { %1445 = vst [vmem:[%s2523_s19 + $0xe8] sm:$0xff] %v1413_v4  ;;  %v1376_v41 = vmul.f32 %v2509_v26, %v1337_v40 }
 0x358   : > { %1446 = vst [vmem:[%s2523_s19 + $0xf0] sm:$0xff] %v1414_v31 }
 0x359   : > { %v1415_v43 = vadd.f32 %v2517_v37, %v1376_v41 }
 0x35b   : > { %1447 = vst [vmem:[%s2523_s19 + $0xf8] sm:$0xff] %v1415_v43 }
 0x35c   : > { %1883 = shalt.err (!%p1880_p3)
}
 0x35d   : > { %s1884_s13 = scalar_lea.hbm %s2651_s8, 4096  ;;  %s1888_s18 = scalar_lea.hbm %s2707_s7, 8192 }
 0x35e   : > { %p1885_p4 = scmp.ne.s32.totalorder %s2651_s8, %s1884_s13  ;;  %p1889_p9 = scmp.lt.u32.totalorder %s2651_s8, %s2707_s7 }
 0x35f   : > { %p1890_p10 = scmp.lt.u32.totalorder %s1888_s18, %s1884_s13  ;;  %p1892_p12 = scmp.lt.u32.totalorder %s1884_s13, %s2651_s8 }
 0x360   : > { %p1886_p7 = pnand %p1885_p4, %p2015_p5 }
 0x361   : > { %p1891_p11 = por %p1890_p10, %p1889_p9 }
 0x362   : > { %p1887_p8 = pneg %p1886_p7 }
 0x363   : > { %p1893_p13 = por %p1892_p12, %p1891_p11 }
 0x365   : > { %p1894_p0 = pnand %p1893_p13, %p1887_p8 }
 0x367   : > { %1897 = shalt.err (!%p1894_p0)
}
 0x368   : > { %s1935_s22 = smov 128   ;;  %s1936_s29 = smov 8  }
 0x369   : > { %1717 = dma.vmem_to_hbm [thread:$0]  (%p2015_p5), %s2653_s21, 4096, %s2651_s8, %s2659_s28, %s1935_s22, %s1935_s22, %s1936_s29  }
 0x36a PF: > { %p1723_p1 = scmp.ge.s32.totalorder %s1932_s27, 2  ;;  %s1477_s23 = sand.u32 1, %s1920_s24  }
 0x36b   : > { %s1478_s9 = scalar_lea.sflag [#allocation3], %s1477_s23 }
 0x36c   : > { %p1720_p2 = pnand %p1723_p1, %p2019_p6 }
 0x36e   : > { %1915 = dma.done.wait (!%p1720_p2), %s1478_s9, 4096  }
 0x36f   : > { %1917 = vsyncadd (!%p1720_p2), %s1478_s9, 4294963200  ;;  %p17_p3 = scmp.ge.s32.totalorder %s2002_s30, 4   ;;  %s2710_s24 = smov %s1924_s25 }
 0x370   : > { %s2711_s25 = smov %s1928_s26  ;;  %s2712_s26 = smov %s2013_s10 }
 0x371   : > { %s2713_s27 = smov %s2002_s30  ;;  %19 = sbr.rel (!%p17_p3) target bundleno = 3 (0x3), region = 83 }
 0x378   :  { %1483 = vsyncpa [#allocation3], 1 }
 0x379   :  { %1485 = vsyncpa [#allocation3 + $0x1], 1 }

</bundles_post_ra>
